<compile_context>
chip_gen: v5e
topology: v5e:2x2
jax: 0.10.0
libtpu: 0.0.40
codegen_flags: <defaults>
</compile_context>

<pallas_src>
import jax
import jax.numpy as jnp
from jax.experimental import pallas as pl
from jax.experimental.pallas import tpu as pltpu

BN_EPS = 1e-5


def _layer1_kernel(x_ref, w1_ref, h_ref, stats_ref):
    # Layer-1 matmul for one batch tile: bf16 MXU inputs -> f32 accumulation.
    h = jnp.dot(x_ref[...], w1_ref[...], preferred_element_type=jnp.float32)
    # One-pass partial BatchNorm statistics for this tile (per feature).
    ssum = jnp.sum(h, axis=0, keepdims=True)       # (1, H)
    ssq = jnp.sum(h * h, axis=0, keepdims=True)    # (1, H)
    stats_ref[...] = jnp.concatenate([ssum, ssq], axis=0)[None]  # (1, 2, H)
    h_ref[...] = h.astype(h_ref.dtype)


def _layer2_kernel(h_ref, scale_ref, shift_ref, w2_ref, b2_ref, o_ref):
    # Folded BN (single scale/shift) + ReLU, then layer-2 matmul on the MXU.
    h = h_ref[...].astype(jnp.float32)
    hn = jnp.maximum(h * scale_ref[...] + shift_ref[...], 0.0)
    y = jnp.dot(hn.astype(w2_ref.dtype), w2_ref[...],
                preferred_element_type=jnp.float32) + b2_ref[...]
    o_ref[...] = y.astype(o_ref.dtype)


def prediction_mlp(x, w1, b1, gamma, beta, w2, b2, *, tile_b=128):
    """Forward pass of prediction_MLP.

    b1 is accepted for parity with the PyTorch module but is unused: a
    per-feature bias added before BatchNorm is exactly cancelled when the
    batch mean is subtracted, so the output is identical without it.
    """
    del b1
    B, in_dim = x.shape
    hidden = w1.shape[1]
    out_dim = w2.shape[1]
    if B % tile_b != 0:
        tile_b = B                      # small / ragged batches: single tile
    num_tiles = B // tile_b

    xb = x.astype(jnp.bfloat16)
    w1b = w1.astype(jnp.bfloat16)
    w2b = w2.astype(jnp.bfloat16)

    # ---- pass 1: layer-1 matmul tiles + per-tile partial BN statistics ----
    h, partial = pl.pallas_call(
        _layer1_kernel,
        out_shape=(jax.ShapeDtypeStruct((B, hidden), jnp.bfloat16),
                   jax.ShapeDtypeStruct((num_tiles, 2, hidden), jnp.float32)),
        grid=(num_tiles,),
        in_specs=[pl.BlockSpec((tile_b, in_dim), lambda i: (i, 0)),
                  pl.BlockSpec((in_dim, hidden), lambda i: (0, 0))],
        out_specs=(pl.BlockSpec((tile_b, hidden), lambda i: (i, 0)),
                   pl.BlockSpec((1, 2, hidden), lambda i: (i, 0, 0))),
        compiler_params=pltpu.CompilerParams(
            dimension_semantics=("parallel",)),
    )(xb, w1b)

    # ---- tiny per-feature reduction + BN fold (negligible vs the matmuls) ----
    g = gamma.reshape(-1).astype(jnp.float32)
    bt = beta.reshape(-1).astype(jnp.float32)
    sums = jnp.sum(partial, axis=0)                 # (2, hidden)
    mean = sums[0] / B
    var = sums[1] / B - mean * mean                 # biased batch variance
    inv = jax.lax.rsqrt(var + BN_EPS)
    scale = (g * inv).reshape(1, hidden)
    shift = (bt - mean * g * inv).reshape(1, hidden)

    # ---- pass 2: folded BN + ReLU + layer-2 matmul ----
    y = pl.pallas_call(
        _layer2_kernel,
        out_shape=jax.ShapeDtypeStruct((B, out_dim), jnp.float32),
        grid=(num_tiles,),
        in_specs=[pl.BlockSpec((tile_b, hidden), lambda i: (i, 0)),
                  pl.BlockSpec((1, hidden), lambda i: (0, 0)),
                  pl.BlockSpec((1, hidden), lambda i: (0, 0)),
                  pl.BlockSpec((hidden, out_dim), lambda i: (0, 0)),
                  pl.BlockSpec((1, out_dim), lambda i: (0, 0))],
        out_specs=pl.BlockSpec((tile_b, out_dim), lambda i: (i, 0)),
        compiler_params=pltpu.CompilerParams(
            dimension_semantics=("parallel",)),
    )(h, scale, shift, w2b, b2.astype(jnp.float32))
    return y


def init_params(key, in_dim, hidden_dim, out_dim):
    k1, k2, k3, k4 = jax.random.split(key, 4)
    lim1 = 1.0 / jnp.sqrt(in_dim)
    lim2 = 1.0 / jnp.sqrt(hidden_dim)
    w1 = jax.random.uniform(k1, (in_dim, hidden_dim), jnp.float32, -lim1, lim1)
    b1 = jax.random.uniform(k2, (1, hidden_dim), jnp.float32, -lim1, lim1)
    gamma = jnp.ones((1, hidden_dim), jnp.float32)   # BN weight
    beta = jnp.zeros((1, hidden_dim), jnp.float32)   # BN bias
    w2 = jax.random.uniform(k3, (hidden_dim, out_dim), jnp.float32, -lim2, lim2)
    b2 = jax.random.uniform(k4, (1, out_dim), jnp.float32, -lim2, lim2)
    return w1, b1, gamma, beta, w2, b2


def reference_f32(x, w1, b1, gamma, beta, w2, b2):
    """Full-f32 PyTorch semantics (includes b1, proving its cancellation)."""
    h = x @ w1 + b1
    mean = jnp.mean(h, axis=0, keepdims=True)
    var = jnp.mean((h - mean) ** 2, axis=0, keepdims=True)
    h = (h - mean) / jnp.sqrt(var + BN_EPS) * gamma + beta
    h = jnp.maximum(h, 0.0)
    return h @ w2 + b2


def reference_kernel_policy(x, w1, b1, gamma, beta, w2, b2):
    """Mirrors the kernel's dtype policy: bf16 MXU inputs, f32 accumulation,
    bf16 intermediate h, folded BN (b1 omitted — cancelled by batch mean)."""
    del b1
    B = x.shape[0]
    h32 = jnp.dot(x.astype(jnp.bfloat16), w1.astype(jnp.bfloat16),
                  preferred_element_type=jnp.float32)
    mean = jnp.sum(h32, axis=0) / B
    var = jnp.sum(h32 * h32, axis=0) / B - mean * mean
    inv = jax.lax.rsqrt(var + BN_EPS)
    scale = gamma.reshape(-1) * inv
    shift = beta.reshape(-1) - mean * scale
    h16 = h32.astype(jnp.bfloat16).astype(jnp.float32)
    hn = jnp.maximum(h16 * scale + shift, 0.0)
    return jnp.dot(hn.astype(jnp.bfloat16), w2.astype(jnp.bfloat16),
                   preferred_element_type=jnp.float32) + b2


if __name__ == "__main__":
    # Small shapes consistent with the module's bottleneck structure
    # (in_dim = out_dim > hidden_dim); batch chosen so the grid has >1 tile.
    B, IN_DIM, HIDDEN_DIM, OUT_DIM = 256, 256, 128, 256

    key = jax.random.PRNGKey(0)
    kx, kp = jax.random.split(key)
    x = jax.random.normal(kx, (B, IN_DIM), jnp.float32)
    params = init_params(kp, IN_DIM, HIDDEN_DIM, OUT_DIM)

    out = jax.block_until_ready(prediction_mlp(x, *params))
    assert out.shape == (B, OUT_DIM)

    # Strict check against a reference applying the same bf16/f32 dtype policy.
    ref_strict = reference_kernel_policy(x, *params)
    assert jnp.allclose(out, ref_strict, atol=2e-3, rtol=2e-3), (
        float(jnp.max(jnp.abs(out - ref_strict))))

    # Loose sanity check against full-f32 PyTorch semantics (including b1):
    # deviation is bounded by bf16 input rounding of the two matmuls.
    ref32 = reference_f32(x, *params)
    assert float(jnp.max(jnp.abs(out - ref32))) < 1e-1

    print("KERNEL_OK")
</pallas_src>

<mosaic_0001>
module attributes {stable_mosaic.version = 11 : i64} {
  func.func @_layer1_kernel(%arg0: i32, %arg1: memref<128x256xbf16, #tpu.memory_space<vmem>>, %arg2: memref<256x128xbf16, #tpu.memory_space<vmem>>, %arg3: memref<128x128xbf16, #tpu.memory_space<vmem>>, %arg4: memref<1x2x128xf32, #tpu.memory_space<vmem>>) attributes {dimension_semantics = [#tpu.dimension_semantics<parallel>], iteration_bounds = array<i64: 2>, scalar_prefetch = 0 : i64, scratch_operands = 0 : i64, tpu.core_type = #tpu.core_type<tc>, window_params = [{transform_indices = @transform_0, window_bounds = array<i64: 128, 256>}, {pipeline_mode = #tpu.pipeline_mode<synchronous>, transform_indices = @transform_1, window_bounds = array<i64: 256, 128>}, {transform_indices = @transform_2, window_bounds = array<i64: 128, 128>}, {transform_indices = @transform_3, window_bounds = array<i64: 1, 2, 128>}]} {
    %c0 = arith.constant 0 : index
    %c0_0 = arith.constant 0 : index
    %0 = vector.load %arg1[%c0, %c0_0] : memref<128x256xbf16, #tpu.memory_space<vmem>>, vector<128x256xbf16>
    %c0_1 = arith.constant 0 : index
    %c0_2 = arith.constant 0 : index
    %1 = vector.load %arg2[%c0_1, %c0_2] : memref<256x128xbf16, #tpu.memory_space<vmem>>, vector<256x128xbf16>
    %cst = arith.constant dense<0.000000e+00> : vector<128x128xf32>
    %2 = tpu.matmul %0, %1, %cst {dimension_numbers = #tpu.dot_dimension_numbers<[1], [0], [0], [1], [0, 0, 1, 1], [], []>} : vector<128x256xbf16>, vector<256x128xbf16>, vector<128x128xf32> -> vector<128x128xf32>
    %cst_3 = arith.constant dense<0.000000e+00> : vector<128xf32>
    %3 = vector.multi_reduction <add>, %2, %cst_3 [0] : vector<128x128xf32> to vector<128xf32>
    %4 = vector.shape_cast %3 : vector<128xf32> to vector<1x128xf32>
    %5 = arith.mulf %2, %2 : vector<128x128xf32>
    %cst_4 = arith.constant dense<0.000000e+00> : vector<128xf32>
    %6 = vector.multi_reduction <add>, %5, %cst_4 [0] : vector<128x128xf32> to vector<128xf32>
    %7 = vector.shape_cast %6 : vector<128xf32> to vector<1x128xf32>
    %8 = tpu.concatenate %4, %7 in 0 : vector<1x128xf32>, vector<1x128xf32> -> vector<2x128xf32>
    %9 = vector.shape_cast %8 : vector<2x128xf32> to vector<1x2x128xf32>
    %c0_5 = arith.constant 0 : index
    %c0_6 = arith.constant 0 : index
    %c0_7 = arith.constant 0 : index
    %10 = vector.load %arg4[%c0_5, %c0_6, %c0_7] : memref<1x2x128xf32, #tpu.memory_space<vmem>>, vector<1x2x128xf32>
    tpu.vector_store %arg4[%c0_5, %c0_6, %c0_7], %9 {strides = array<i32>} : memref<1x2x128xf32, #tpu.memory_space<vmem>>, vector<1x2x128xf32>,
    %11 = arith.truncf %2 : vector<128x128xf32> to vector<128x128xbf16>
    %c0_8 = arith.constant 0 : index
    %c0_9 = arith.constant 0 : index
    %12 = vector.load %arg3[%c0_8, %c0_9] : memref<128x128xbf16, #tpu.memory_space<vmem>>, vector<128x128xbf16>
    tpu.vector_store %arg3[%c0_8, %c0_9], %11 {strides = array<i32>} : memref<128x128xbf16, #tpu.memory_space<vmem>>, vector<128x128xbf16>,
    return
  }
  func.func @transform_0(%arg0: i32) -> (i32, i32) {
    %c0_i32 = arith.constant 0 : i32
    %c0_i32_0 = arith.constant 0 : i32
    return %arg0, %c0_i32 : i32, i32
  }
  func.func @transform_1(%arg0: i32) -> (i32, i32) {
    %c0_i32 = arith.constant 0 : i32
    %c0_i32_0 = arith.constant 0 : i32
    %c0_i32_1 = arith.constant 0 : i32
    return %c0_i32, %c0_i32_0 : i32, i32
  }
  func.func @transform_2(%arg0: i32) -> (i32, i32) {
    %c0_i32 = arith.constant 0 : i32
    %c0_i32_0 = arith.constant 0 : i32
    return %arg0, %c0_i32 : i32, i32
  }
  func.func @transform_3(%arg0: i32) -> (i32, i32, i32) {
    %c0_i32 = arith.constant 0 : i32
    %c0_i32_0 = arith.constant 0 : i32
    %c0_i32_1 = arith.constant 0 : i32
    return %arg0, %c0_i32, %c0_i32_0 : i32, i32, i32
  }
}

</mosaic_0001>

<bundles_post_ra>
// kernel: tpu_custom_call.1
= control target key start
LH: loop header
LB: loop body
LE: loop exit
PB: predicated region body
PF: predicated region fallthrough
CT: control target
= control target key end

     0   :  { %9 = vsyncpa [#allocation3], 0  ;;  %s1528_s0 = inlined_call_operand.hbm [shape: bf16[256,256], index: 0, kind: input, shape index: {}]   ;;  %s1529_s1 = inlined_call_operand.hbm [shape: bf16[256,128], index: 1, kind: input, shape index: {}]   ;;  %s1530_s2 = inlined_call_operand.hbm [shape: bf16[256,128], index: 2, kind: output, shape index: {0}]   ;;  %s1531_s3 = inlined_call_operand.hbm [shape: f32[2,2,128], index: 3, kind: output, shape index: {1}]  }
   0x1   :  { %11 = vsyncpa [#allocation3 + $0x1], 0 }
   0x2   :  { %12 = vsyncpa [#allocation6], 0 }
   0x3   :  { %13 = vsyncpa [#allocation4], 0 }
   0x4   :  { %15 = vsyncpa [#allocation4 + $0x1], 0 }
   0x5   :  { %16 = vsyncpa [#allocation9], 0 }
   0x6   :  { %18 = vsyncpa [#allocation9 + $0x1], 0  ;;  %s1293_s12 = smov 0   ;;  %s1295_s13 = smov 0  }
   0x7   :  { %s1297_s14 = smov 0   ;;  %s1299_s15 = smov 0  }
   0x8 LB: > { %s1314_s16 = sadd.s32 4294967295, %s1264_s15   ;;  %s788_s17 = sadd.s32 4294967294, %s1264_s15   ;;  %s1264_s15 = sphi %s1299_s15, %s1541_s15   ;;  %s1260_s14 = sphi %s1297_s14, %s1540_s14   ;;  %s1256_s13 = sphi %s1295_s13, %s1539_s13   ;;  %s1252_s12 = sphi %s1293_s12, %s1538_s12  }
   0x9   : > { %p44_p0 = scmp.ne.s32.totalorder %s1256_s13, %s1252_s12  ;;  %p45_p1 = scmp.eq.s32.totalorder %s1314_s16, 0 }
   0xa   : > { %p89_p2 = scmp.eq.s32.totalorder %s1314_s16, 1  ;;  %p95_p3 = scmp.eq.s32.totalorder %s788_s17, 1 }
   0xb   : > { %p1323_p4 = por %p45_p1, %p44_p0  ;;  %p789_p5 = scmp.ge.s32.totalorder %s1264_s15, 1 }
   0xc   : > { %p1328_p6 = por %p95_p3, %p44_p0  ;;  %p128_p7 = scmp.lt.s32.totalorder %s1264_s15, 3 }
   0xd   : > { %s139_s22 = sshll.u32 %s1529_s1, 4  ;;  %s1266_s24 = smov [#allocation5]   ;;  %s140_s22 = int_to_ptr.hbm [resolvable:$true] %s139_s22 }
   0xe   : > { %p1336_p8 = pnand %p789_p5, %p128_p7  ;;  %s141_s25 = sshll.u32 %s1266_s24, 4  ;;  %s142_s25 = int_to_ptr.vmem [resolvable:$true] %s141_s25 }
   0xf   : > { %s1346_s26 = sadd.s32 1, %s1264_s15   ;;  %s1267_s27 = smov 64  }
  0x10   : > { %p1044_p9 = pneg %p1336_p8  ;;  %s1268_s28 = smov 4  }
  0x11   : > { %s28_s29 = ssub.s32 %s1264_s15, %s1346_s26  ;;  %s31_s30 = sadd.s32 1, %s1260_s14 }
  0x12   : > { %p1045_p10 = pnand %p1044_p9, %p45_p1  ;;  %p29_p12 = scmp.eq.s32.totalorder %s28_s29, 0 }
  0x13   : > { %p38_p13 = scmp.ne.s32.totalorder %s1260_s14, %s1256_s13  ;;  %p39_p0 = scmp.eq.s32.totalorder %s1264_s15, 0 }
  0x14   : > { %1047 = dma.hbm_to_vmem [thread:$0]  (!%p1045_p10), %s140_s22, 2048, %s142_s25, [#allocation6], %s1267_s27, %s1267_s27, %s1268_s28  }
  0x15   : > { %p1060_p3 = scmp.lt.s32.totalorder %s1264_s15, 2  ;;  %p40_p5 = por %p39_p0, %p38_p13 }
  0x16   : > { %s1356_s4 = scalar_select %p29_p12, %s1260_s14, %s31_s30  }
  0x17   : > { %p1360_p7 = por %p89_p2, %p38_p13  ;;  %s155_s6 = sand.u32 1, %s1260_s14  }
  0x18   : > { %s937_s7 = sshll.u32 %s1264_s15, 7  ;;  %s792_s8 = sshll.u32 %s155_s6, 7 }
  0x19   : > { %s165_s11 = scalar_lea.hbm %s1528_s0, %s937_s7  ;;  %s159_s20 = scalar_lea.vmem [#allocation2], %s792_s8 }
  0x1a   : > { %s166_s17 = sshll.u32 %s165_s11, 4  ;;  %s168_s21 = sshll.u32 %s159_s20, 4  ;;  %s167_s17 = int_to_ptr.hbm [resolvable:$true] %s166_s17  ;;  %s169_s21 = int_to_ptr.vmem [resolvable:$true] %s168_s21 }
  0x1b   : > { %p1371_p9 = pnand %p1060_p3, %p40_p5  ;;  %s156_s24 = scalar_lea.sflag [#allocation3], %s155_s6 }
  0x1c   : > { %s1132_s25 = sshra.s32 %s167_s17, 4  ;;  %s1139_s30 = scalar_lea.hbm %s1528_s0, 256  ;;  %s1133_s25 = int_to_ptr.hbm [resolvable:$true] %s1132_s25 }
  0x1d   : > { %s1134_s27 = scalar_lea.hbm %s1133_s25, 128  ;;  %p1136_p10 = pneg %p1371_p9 }
  0x1e   : > { %p1135_p2 = scmp.ne.s32.totalorder %s1133_s25, %s1134_s27  ;;  %p1140_p0 = scmp.lt.s32.totalorder %s1133_s25, %s1528_s0 }
  0x1f   : > { %p1141_p3 = scmp.lt.s32.totalorder %s1139_s30, %s1134_s27 }
  0x20   : > { %p1137_p12 = pnand %p1136_p10, %p1135_p2 }
  0x21   : > { %p1142_p5 = por %p1141_p3, %p1140_p0 }
  0x22   : > { %p1138_p13 = pneg %p1137_p12 }
  0x24   : > { %p1143_p11 = pnand %p1142_p5, %p1138_p13 }
  0x26   : > { %1146 = shalt.err (!%p1143_p11)
}
  0x27   : > { %s1269_s6 = smov 128   ;;  %s1270_s9 = smov 8  }
  0x28   : > { %1051 = dma.hbm_to_vmem [thread:$0]  (!%p1371_p9), %s167_s17, 2048, %s169_s21, %s156_s24, %s1269_s6, %s1269_s6, %s1270_s9  }
  0x29   : > { %180 = sbr.rel (%p1336_p8) target bundleno = 302 (0x12e), region = 28  ;;  %s1388_s10 = sand.u32 (!%p1336_p8), 1, %s1256_s13  }
  0x2a   : > { %s797_s11 = sshll.u32 (!%p1336_p8), %s1388_s10, 7  ;;  %s183_s20 = scalar_lea.sflag (!%p1336_p8), [#allocation3], %s1388_s10 }
  0x2b   : > { %s1392_s25 = scalar_lea.vmem (!%p1336_p8), [#allocation2], %s797_s11 }
  0x2e   : > { %1235 = dma.done.wait (%p1323_p4), %s183_s20, 2048  }
  0x2f   : > { %1237 = vsyncadd (%p1323_p4), %s183_s20, 4294965248 }
  0x30   : > { %1239 = dma.done.wait (%p45_p1), [#allocation6], 2048  }
  0x31   : > { %1241 = vsyncadd (%p45_p1), [#allocation6], 4294965248  ;;  %v961_v0 = vld [vmem:[#allocation5 + $0x38] sm:$0xff]  ;;  %v960_v2 = vld [vmem:[#allocation5 + $0x30] sm:$0xff]  ;;  %s799_s18 = sshll.u32 %s1388_s10, 6  ;;  %s970_s17 = sshll.u32 %s1314_s16, 6 }
  0x32   : > { %v969_v1 = vld [vmem:[#allocation5 + $0x78] sm:$0xff]  ;;  %446 = vmatpush.bf16.msra.mxu0 %v961_v0  ;;  %v968_v3 = vld [vmem:[#allocation5 + $0x70] sm:$0xff]  ;;  %1018 = vmatpush.bf16.msra.mxu2 %v961_v0  ;;  %v959_v4 = vld [vmem:[#allocation5 + $0x28] sm:$0xff]  ;;  %s1435_s23 = scalar_lea.vmem [#allocation7], %s799_s18  ;;  %s654_s24 = scalar_lea.hbm %s1530_s2, %s970_s17 }
  0x33   : > { %495 = vmatpush.bf16.msra.mxu1 %v969_v1  ;;  %1026 = vmatpush.bf16.msra.mxu3 %v969_v1  ;;  %v967_v5 = vld [vmem:[#allocation5 + $0x68] sm:$0xff]  ;;  %v958_v6 = vld [vmem:[#allocation5 + $0x20] sm:$0xff]  ;;  %v957_v8 = vld [vmem:[#allocation5 + $0x18] sm:$0xff]  ;;  %s655_s27 = sshll.u32 %s1435_s23, 4  ;;  %s657_s28 = sshll.u32 %s654_s24, 4  ;;  %s1473_s27 = int_to_ptr.vmem [resolvable:$true] %s655_s27  ;;  %s658_s28 = int_to_ptr.hbm [resolvable:$true] %s657_s28 }
  0x34   : > { %v966_v7 = vld [vmem:[#allocation5 + $0x60] sm:$0xff]  ;;  %v965_v9 = vld [vmem:[#allocation5 + $0x58] sm:$0xff]  ;;  %v956_v10 = vld [vmem:[#allocation5 + $0x10] sm:$0xff]  ;;  %s638_s29 = scalar_lea.sflag [#allocation4], %s1388_s10  ;;  %s1176_s30 = sshra.s32 %s658_s28, 4  ;;  %s1177_s30 = int_to_ptr.hbm [resolvable:$true] %s1176_s30 }
  0x35   : > { %v964_v11 = vld [vmem:[#allocation5 + $0x50] sm:$0xff]  ;;  %v955_v12 = vld [vmem:[#allocation5 + $0x8] sm:$0xff]  ;;  %v954_v14 = vld [vmem:[#allocation5] sm:$0xff]  ;;  %s1178_s7 = scalar_lea.hbm %s1177_s30, 64  ;;  %s1182_s9 = scalar_lea.hbm %s1530_s2, 128 }
  0x36   : > { %447 = vmatpush.bf16.msra.mxu0 %v960_v2  ;;  %1019 = vmatpush.bf16.msra.mxu2 %v960_v2  ;;  %v963_v13 = vld [vmem:[#allocation5 + $0x48] sm:$0xff]  ;;  %v962_v15 = vld [vmem:[#allocation5 + $0x40] sm:$0xff]  ;;  %v811_v28 = vld [vmem:[%s1392_s25 + $0x10] sm:$0xf]  ;;  %p1179_p1 = scmp.ne.s32.totalorder %s1177_s30, %s1178_s7  ;;  %p1183_p11 = scmp.lt.s32.totalorder %s1177_s30, %s1530_s2 }
  0x37   : > { %496 = vmatpush.bf16.msra.mxu1 %v968_v3  ;;  %1027 = vmatpush.bf16.msra.mxu3 %v968_v3  ;;  %v803_v16 = vld [vmem:[%s1392_s25] sm:$0xf]  ;;  %v939_v17 = vld [vmem:[%s1392_s25 + $0x4] sm:$0xf0]  ;;  %v938_v18 = vld [vmem:[%s1392_s25 + $0x4] sm:$0xf]  ;;  %p1184_p9 = scmp.lt.s32.totalorder %s1182_s9, %s1178_s7 }
  0x38   : > { %v805_v19 = vld [vmem:[%s1392_s25 + $0x8] sm:$0xf0]  ;;  %v835_v20 = vld [vmem:[%s1392_s25 + $0x40] sm:$0xf]  ;;  %v947_v21 = vld [vmem:[%s1392_s25 + $0x44] sm:$0xf0]  ;;  %v804_v24 = vor.u32 %v939_v17, %v803_v16  ;;  %p1180_p4 = pnand %p1179_p1, %p1360_p7 }
  0x39   : > { %v946_v22 = vld [vmem:[%s1392_s25 + $0x44] sm:$0xf]  ;;  %v837_v23 = vld [vmem:[%s1392_s25 + $0x48] sm:$0xf0]  ;;  %v808_v25 = vor.u32 %v938_v18, %v805_v19  ;;  %v836_v26 = vor.u32 %v947_v21, %v835_v20  ;;  %v941_v29 = vld [vmem:[%s1392_s25 + $0x14] sm:$0xf0]  ;;  %p1185_p2 = por %p1184_p9, %p1183_p11 }
  0x3a   : > { %448 = vmatpush.bf16.msra.mxu0 %v959_v4  ;;  %1020 = vmatpush.bf16.msra.mxu2 %v959_v4  ;;  %v840_v27 = vor.u32 %v946_v22, %v837_v23  ;;  %v940_v30 = vld [vmem:[%s1392_s25 + $0x14] sm:$0xf]  ;;  %v813_v31 = vld [vmem:[%s1392_s25 + $0x18] sm:$0xf0]  ;;  %v843_v32 = vld [vmem:[%s1392_s25 + $0x50] sm:$0xf]  ;;  %v812_v36 = vor.u32 %v941_v29, %v811_v28  ;;  %p1181_p8 = pneg %p1180_p4 }
  0x3b   : > { %497 = vmatpush.bf16.msra.mxu1 %v967_v5  ;;  %1028 = vmatpush.bf16.msra.mxu3 %v967_v5  ;;  %v949_v33 = vld [vmem:[%s1392_s25 + $0x54] sm:$0xf0]  ;;  %v948_v34 = vld [vmem:[%s1392_s25 + $0x54] sm:$0xf]  ;;  %v845_v35 = vld [vmem:[%s1392_s25 + $0x58] sm:$0xf0]  ;;  %v816_v37 = vor.u32 %v940_v30, %v813_v31 }
  0x3c   : > { %v844_v38 = vor.u32 %v949_v33, %v843_v32  ;;  %v848_v39 = vor.u32 %v948_v34, %v845_v35  ;;  %v819_v40 = vld [vmem:[%s1392_s25 + $0x20] sm:$0xf]  ;;  %v943_v41 = vld [vmem:[%s1392_s25 + $0x24] sm:$0xf0]  ;;  %v942_v42 = vld [vmem:[%s1392_s25 + $0x24] sm:$0xf]  ;;  %p1186_p10 = pnand %p1185_p2, %p1181_p8 }
  0x3d   : > { %v821_v43 = vld [vmem:[%s1392_s25 + $0x28] sm:$0xf0]  ;;  %v851_v44 = vld [vmem:[%s1392_s25 + $0x60] sm:$0xf]  ;;  %v951_v45 = vld [vmem:[%s1392_s25 + $0x64] sm:$0xf0]  ;;  %v820_v48 = vor.u32 %v943_v41, %v819_v40 }
  0x3e   : > { %449 = vmatpush.bf16.msra.mxu0 %v958_v6  ;;  %1021 = vmatpush.bf16.msra.mxu2 %v958_v6  ;;  %v950_v46 = vld [vmem:[%s1392_s25 + $0x64] sm:$0xf]  ;;  %v853_v47 = vld [vmem:[%s1392_s25 + $0x68] sm:$0xf0]  ;;  %v824_v49 = vor.u32 %v942_v42, %v821_v43  ;;  %v852_v50 = vor.u32 %v951_v45, %v851_v44  ;;  %v827_v52 = vld [vmem:[%s1392_s25 + $0x30] sm:$0xf] }
  0x3f   : > { %498 = vmatpush.bf16.msra.mxu1 %v966_v7  ;;  %1029 = vmatpush.bf16.msra.mxu3 %v966_v7  ;;  %v856_v51 = vor.u32 %v950_v46, %v853_v47  ;;  %v945_v53 = vld [vmem:[%s1392_s25 + $0x34] sm:$0xf0]  ;;  %v944_v54 = vld [vmem:[%s1392_s25 + $0x34] sm:$0xf]  ;;  %v829_v55 = vld [vmem:[%s1392_s25 + $0x38] sm:$0xf0] }
  0x40   : > { %v859_v56 = vld [vmem:[%s1392_s25 + $0x70] sm:$0xf]  ;;  %v953_v57 = vld [vmem:[%s1392_s25 + $0x74] sm:$0xf0]  ;;  %v952_v58 = vld [vmem:[%s1392_s25 + $0x74] sm:$0xf]  ;;  %v828_v60 = vor.u32 %v945_v53, %v827_v52  ;;  %v832_v61 = vor.u32 %v944_v54, %v829_v55 }
  0x41   : > { %v861_v59 = vld [vmem:[%s1392_s25 + $0x78] sm:$0xf0]  ;;  %v860_v62 = vor.u32 %v953_v57, %v859_v56 }
  0x42   : > { %450 = vmatpush.bf16.msra.mxu0 %v957_v8  ;;  %1022 = vmatpush.bf16.msra.mxu2 %v957_v8  ;;  %v864_v63 = vor.u32 %v952_v58, %v861_v59 }
  0x43   : > { %499 = vmatpush.bf16.msra.mxu1 %v965_v9  ;;  %1030 = vmatpush.bf16.msra.mxu3 %v965_v9 }
  0x46   : > { %451 = vmatpush.bf16.msra.mxu0 %v956_v10  ;;  %1023 = vmatpush.bf16.msra.mxu2 %v956_v10 }
  0x47   : > { %500 = vmatpush.bf16.msra.mxu1 %v964_v11  ;;  %1031 = vmatpush.bf16.msra.mxu3 %v964_v11 }
  0x4a   : > { %452 = vmatpush.bf16.msra.mxu0 %v955_v12  ;;  %1024 = vmatpush.bf16.msra.mxu2 %v955_v12 }
  0x4b   : > { %501 = vmatpush.bf16.msra.mxu1 %v963_v13  ;;  %1032 = vmatpush.bf16.msra.mxu3 %v963_v13 }
  0x4e   : > { %453 = vmatpush.bf16.msra.mxu0 %v954_v14  ;;  %1025 = vmatpush.bf16.msra.mxu2 %v954_v14 }
  0x4f   : > { %502 = vmatpush.bf16.msra.mxu1 %v962_v15  ;;  %1033 = vmatpush.bf16.msra.mxu3 %v962_v15 }
  0x51   : > { %454 = vmatmul.bf16.vlgmr.msra.gmra.mxu0 %v804_v24  ;;  %474 = vmatmul.bf16.vlgmr.msra.gmra.mxu2 %v836_v26 }
  0x52   : > { %503 = vmatmul.bf16.vlgmr.msra.gmra.mxu1 %v808_v25  ;;  %523 = vmatmul.bf16.vlgmr.msra.gmra.mxu3 %v840_v27 }
  0x61   : > { %459 = vmatmul.bf16.gmra.mxu0 %v812_v36  ;;  %479 = vmatmul.bf16.gmra.mxu2 %v844_v38 }
  0x62   : > { %508 = vmatmul.bf16.gmra.mxu1 %v816_v37  ;;  %528 = vmatmul.bf16.gmra.mxu3 %v848_v39 }
  0x71   : > { %464 = vmatmul.bf16.gmra.mxu0 %v820_v48  ;;  %484 = vmatmul.bf16.gmra.mxu2 %v852_v50 }
  0x72   : > { %513 = vmatmul.bf16.gmra.mxu1 %v824_v49  ;;  %533 = vmatmul.bf16.gmra.mxu3 %v856_v51 }
  0x81   : > { %469 = vmatmul.bf16.gmra.mxu0 %v828_v60  ;;  %489 = vmatmul.bf16.gmra.mxu2 %v860_v62 }
  0x82   : > { %518 = vmatmul.bf16.gmra.mxu1 %v832_v61  ;;  %538 = vmatmul.bf16.gmra.mxu3 %v864_v63 }
  0xce   : > { %v455_v0 = vpop.f32.mrf.mxu0 }
  0xcf   : > { %v504_v1 = vpop.f32.mrf.mxu1 }
  0xd0   : > { %v505_v6 = vadd.f32 %v504_v1, %v455_v0 }
  0xd2   : > { %v565_v39 = vmul.f32 %v505_v6, %v505_v6 }
  0xd4   : > { %v475_v2 = vpop.f32.mrf.mxu2 }
  0xd5   : > { %v524_v3 = vpop.f32.mrf.mxu3 }
  0xd6   : > { %v457_v4 = vpop.f32.mrf.mxu0  ;;  %v1438_v9 = vadd.f32 %v524_v3, %v475_v2 }
  0xd7   : > { %v506_v5 = vpop.f32.mrf.mxu1 }
  0xd8   : > { %v507_v7 = vadd.f32 %v506_v5, %v457_v4 }
  0xda   : > { %v974_v8 = vpack.c.bf16 %v507_v7, %v505_v6  ;;  %v566_v37 = vmul.f32 %v507_v7, %v507_v7  ;;  %v544_v40 = vadd.f32 %v507_v7, %v505_v6 }
  0xdc   : > { %975 = vst [vmem:[%s1435_s23] sm:$0xff] %v974_v8   ;;  %v477_v10 = vpop.f32.mrf.mxu2  ;;  %v581_v47 = vadd.f32 %v566_v37, %v565_v39  ;;  %v573_v8 = vmul.f32 %v1438_v9, %v1438_v9 }
  0xdd   : > { %v526_v11 = vpop.f32.mrf.mxu3 }
  0xde   : > { %v460_v12 = vpop.f32.mrf.mxu0  ;;  %v1440_v14 = vadd.f32 %v526_v11, %v477_v10 }
  0xdf   : > { %v509_v13 = vpop.f32.mrf.mxu1 }
  0xe0   : > { %v994_v15 = vpack.c.bf16 %v1440_v14, %v1438_v9  ;;  %v510_v20 = vadd.f32 %v509_v13, %v460_v12  ;;  %v574_v13 = vmul.f32 %v1440_v14, %v1440_v14 }
  0xe2   : > { %1014 = vst [vmem:[%s1435_s23 + $0x20] sm:$0xff] %v994_v15   ;;  %v567_v41 = vmul.f32 %v510_v20, %v510_v20  ;;  %v545_v48 = vadd.f32 %v544_v40, %v510_v20 }
  0xe4   : > { %v480_v16 = vpop.f32.mrf.mxu2  ;;  %v582_v51 = vadd.f32 %v581_v47, %v567_v41 }
  0xe5   : > { %v529_v17 = vpop.f32.mrf.mxu3 }
  0xe6   : > { %v462_v18 = vpop.f32.mrf.mxu0  ;;  %v1446_v23 = vadd.f32 %v529_v17, %v480_v16 }
  0xe7   : > { %v511_v19 = vpop.f32.mrf.mxu1 }
  0xe8   : > { %v512_v21 = vadd.f32 %v511_v19, %v462_v18 }
  0xea   : > { %v979_v22 = vpack.c.bf16 %v512_v21, %v510_v20  ;;  %v568_v49 = vmul.f32 %v512_v21, %v512_v21  ;;  %v546_v52 = vadd.f32 %v545_v48, %v512_v21  ;;  %v575_v20 = vmul.f32 %v1446_v23, %v1446_v23 }
  0xec   : > { %1011 = vst [vmem:[%s1435_s23 + $0x8] sm:$0xff] %v979_v22   ;;  %v482_v24 = vpop.f32.mrf.mxu2  ;;  %v583_v55 = vadd.f32 %v582_v51, %v568_v49 }
  0xed   : > { %v531_v25 = vpop.f32.mrf.mxu3 }
  0xee   : > { %v465_v26 = vpop.f32.mrf.mxu0  ;;  %v1448_v28 = vadd.f32 %v531_v25, %v482_v24 }
  0xef   : > { %v514_v27 = vpop.f32.mrf.mxu1 }
  0xf0   : > { %v999_v29 = vpack.c.bf16 %v1448_v28, %v1446_v23  ;;  %v515_v34 = vadd.f32 %v514_v27, %v465_v26  ;;  %v576_v24 = vmul.f32 %v1448_v28, %v1448_v28 }
  0xf2   : > { %1015 = vst [vmem:[%s1435_s23 + $0x28] sm:$0xff] %v999_v29   ;;  %v569_v53 = vmul.f32 %v515_v34, %v515_v34  ;;  %v547_v56 = vadd.f32 %v546_v52, %v515_v34 }
  0xf4   : > { %v485_v30 = vpop.f32.mrf.mxu2  ;;  %v584_v58 = vadd.f32 %v583_v55, %v569_v53 }
  0xf5   : > { %v534_v31 = vpop.f32.mrf.mxu3 }
  0xf6   : > { %v467_v32 = vpop.f32.mrf.mxu0  ;;  %v535_v38 = vadd.f32 %v534_v31, %v485_v30 }
  0xf7   : > { %v516_v33 = vpop.f32.mrf.mxu1 }
  0xf8   : > { %v517_v35 = vadd.f32 %v516_v33, %v467_v32  ;;  %v577_v26 = vmul.f32 %v535_v38, %v535_v38 }
  0xfa   : > { %v984_v36 = vpack.c.bf16 %v517_v35, %v515_v34  ;;  %v570_v57 = vmul.f32 %v517_v35, %v517_v35  ;;  %v548_v59 = vadd.f32 %v547_v56, %v517_v35 }
  0xfc   : > { %1012 = vst [vmem:[%s1435_s23 + $0x10] sm:$0xff] %v984_v36   ;;  %v487_v42 = vpop.f32.mrf.mxu2  ;;  %v585_v1 = vadd.f32 %v584_v58, %v570_v57 }
  0xfd   : > { %v536_v43 = vpop.f32.mrf.mxu3 }
  0xfe   : > { %v470_v44 = vpop.f32.mrf.mxu0  ;;  %v1454_v46 = vadd.f32 %v536_v43, %v487_v42 }
  0xff   : > { %v519_v45 = vpop.f32.mrf.mxu1 }
 0x100   : > { %v1004_v50 = vpack.c.bf16 %v1454_v46, %v535_v38  ;;  %v520_v54 = vadd.f32 %v519_v45, %v470_v44 }
 0x102   : > { %1016 = vst [vmem:[%s1435_s23 + $0x30] sm:$0xff] %v1004_v50   ;;  %v571_v60 = vmul.f32 %v520_v54, %v520_v54  ;;  %v549_v2 = vadd.f32 %v548_v59, %v520_v54 }
 0x104   : > { %v490_v61 = vpop.f32.mrf.mxu2  ;;  %v586_v4 = vadd.f32 %v585_v1, %v571_v60 }
 0x105   : > { %v539_v62 = vpop.f32.mrf.mxu3 }
 0x106   : > { %v472_v63 = vpop.f32.mrf.mxu0  ;;  %v540_v12 = vadd.f32 %v539_v62, %v490_v61 }
 0x107   : > { %v521_v0 = vpop.f32.mrf.mxu1 }
 0x108   : > { %v522_v3 = vadd.f32 %v521_v0, %v472_v63 }
 0x10a   : > { %v550_v5 = vadd.f32 %v549_v2, %v522_v3  ;;  %v572_v6 = vmul.f32 %v522_v3, %v522_v3  ;;  %v989_v7 = vpack.c.bf16 %v522_v3, %v520_v54 }
 0x10c   : > { %v551_v10 = vadd.f32 %v550_v5, %v1438_v9  ;;  %v587_v11 = vadd.f32 %v586_v4, %v572_v6  ;;  %1013 = vst [vmem:[%s1435_s23 + $0x18] sm:$0xff] %v989_v7   ;;  %v492_v17 = vpop.f32.mrf.mxu2 }
 0x10d   : > { %v541_v18 = vpop.f32.mrf.mxu3 }
 0x10e   : > { %v552_v15 = vadd.f32 %v551_v10, %v1440_v14  ;;  %v588_v16 = vadd.f32 %v587_v11, %v573_v8  ;;  %v542_v19 = vadd.f32 %v541_v18, %v492_v17 }
 0x110   : > { %v553_v9 = vadd.f32 %v552_v15, %v1446_v23  ;;  %v589_v21 = vadd.f32 %v588_v16, %v574_v13  ;;  %v1009_v22 = vpack.c.bf16 %v542_v19, %v540_v12 }
 0x112   : > { %v590_v14 = vadd.f32 %v589_v21, %v575_v20  ;;  %v554_v25 = vadd.f32 %v553_v9, %v1448_v28  ;;  %1017 = vst [vmem:[%s1435_s23 + $0x38] sm:$0xff] %v1009_v22  }
 0x114   : > { %v555_v27 = vadd.f32 %v554_v25, %v535_v38  ;;  %v591_v29 = vadd.f32 %v590_v14, %v576_v24 }
 0x115   : > { %1189 = shalt.err (!%p1186_p10)
}
 0x116   : > { %s1271_s25 = smov 64   ;;  %s1272_s18 = smov 4   ;;  %v578_v23 = vmul.f32 %v1454_v46, %v1454_v46  ;;  %v556_v28 = vadd.f32 %v555_v27, %v1454_v46  ;;  %v592_v30 = vadd.f32 %v591_v29, %v577_v26  ;;  %v579_v32 = vmul.f32 %v540_v12, %v540_v12 }
 0x117   : > { %1040 = dma.vmem_to_hbm [thread:$0]  (%p1360_p7), %s1473_s27, 1024, %s658_s28, %s638_s29, %s1271_s25, %s1271_s25, %s1272_s18   ;;  %v580_v36 = vmul.f32 %v542_v19, %v542_v19  ;;  %vm602_vm0 = vcmask 1040384  }
 0x118   : > { %v557_v31 = vadd.f32 %v556_v28, %v540_v12  ;;  %v593_v33 = vadd.f32 %v592_v30, %v578_v23  ;;  %s800_s23 = sshll.u32 %s1388_s10, 1  ;;  %s933_s17 = sshll.u32 %s1314_s16, 1 }
 0x119   : > { %s670_s24 = scalar_lea.hbm %s1531_s3, %s933_s17  ;;  %s219_s27 = scalar_lea.vmem [#allocation8], %s800_s23 }
 0x11a   : > { %v594_v34 = vadd.f32 %v593_v33, %v579_v32  ;;  %v558_v35 = vadd.f32 %v557_v31, %v542_v19  ;;  %s672_s28 = sshll.u32 %s219_s27, 4  ;;  %s674_s29 = sshll.u32 %s670_s24, 4  ;;  %s673_s28 = int_to_ptr.vmem [resolvable:$true] %s672_s28  ;;  %s675_s29 = int_to_ptr.hbm [resolvable:$true] %s674_s29 }
 0x11b   : > { %s643_s16 = scalar_lea.sflag [#allocation9], %s1388_s10  ;;  %s1204_s30 = sshra.s32 %s675_s29, 4  ;;  %s1205_s30 = int_to_ptr.hbm [resolvable:$true] %s1204_s30 }
 0x11c   : > { %v559_v37 = vrot.slane %v558_v35, 4  ;;  %v595_v38 = vadd.f32 %v594_v34, %v580_v36  ;;  %s1206_s7 = scalar_lea.hbm %s1205_s30, 2  ;;  %s1210_s9 = scalar_lea.hbm %s1531_s3, 4 }
 0x11d   : > { %p1207_p12 = scmp.ne.s32.totalorder %s1205_s30, %s1206_s7  ;;  %p1211_p3 = scmp.lt.s32.totalorder %s1205_s30, %s1531_s3 }
 0x11e   : > { %v560_v39 = vadd.f32 %v559_v37, %v558_v35  ;;  %v596_v40 = vrot.slane %v595_v38, 4  ;;  %p1212_p5 = scmp.lt.s32.totalorder %s1210_s9, %s1206_s7 }
 0x11f   : > { %p1208_p13 = pnand %p1207_p12, %p1360_p7 }
 0x120   : > { %v561_v41 = vrot.slane %v560_v39, 2  ;;  %v597_v42 = vadd.f32 %v596_v40, %v595_v38  ;;  %p1213_p1 = por %p1212_p5, %p1211_p3 }
 0x121   : > { %p1209_p0 = pneg %p1208_p13 }
 0x122   : > { %v562_v43 = vadd.f32 %v561_v41, %v560_v39  ;;  %v598_v44 = vrot.slane %v597_v42, 2 }
 0x123   : > { %p1214_p4 = pnand %p1213_p1, %p1209_p0 }
 0x124   : > { %v563_v45 = vrot.slane %v562_v43, 1  ;;  %v599_v46 = vadd.f32 %v598_v44, %v597_v42 }
 0x126   : > { %v600_v47 = vrot.slane %v599_v46, 1  ;;  %v564_v48 = vadd.f32 %v563_v45, %v562_v43 }
 0x128   : > { %v601_v49 = vadd.f32 %v600_v47, %v599_v46 }
 0x12a   : > { %v603_v50 = vsel %vm602_vm0, %v564_v48, %v601_v49 }
 0x12b   : > { %604 = vst [vmem:[%s219_s27] sm:$0x3] %v603_v50 }
 0x12c   : > { %1217 = shalt.err (!%p1214_p4)
}
 0x12d   : > { %1041 = dma.vmem_to_hbm [thread:$0]  (%p1360_p7), %s673_s28, 32, %s675_s29, %s643_s16  }
 0x12e PF: > { %s686_s10 = sand.u32 1, %s1252_s12   ;;  %p1537_p8 = scmp.ge.s32.totalorder %s1264_s15, 2 }
 0x12f   : > { %s687_s25 = scalar_lea.sflag [#allocation4], %s686_s10 }
 0x130   : > { %p1053_p11 = pnand %p1537_p8, %p1328_p6 }
 0x132   : > { %p1054_p9 = pneg %p1053_p11 }
 0x134   : > { %1243 = dma.done.wait (%p1054_p9), %s687_s25, 1024  }
 0x135   : > { %1245 = vsyncadd (%p1054_p9), %s687_s25, 4294966272  ;;  %s697_s18 = scalar_lea.sflag [#allocation9], %s686_s10 }
 0x136   : > { %1247 = dma.done.wait (%p1054_p9), %s697_s18, 32  }
 0x137   : > { %1249 = vsyncadd (%p1054_p9), %s697_s18, 4294967264  ;;  %p21_p7 = scmp.ge.s32.totalorder %s1346_s26, 4   ;;  %s1538_s12 = smov %s1256_s13 }
 0x138   : > { %s1539_s13 = smov %s1260_s14  ;;  %s1540_s14 = smov %s1356_s4 }
 0x139   : > { %s1541_s15 = smov %s1346_s26  ;;  %23 = sbr.rel (!%p21_p7) target bundleno = 8 (0x8), region = 94 }
 0x13e   :  { %703 = vsyncpa [#allocation3], 1 }
 0x13f   :  { %705 = vsyncpa [#allocation3 + $0x1], 1 }
 0x140   :  { %706 = vsyncpa [#allocation6], 1 }
 0x141   :  { %707 = vsyncpa [#allocation4], 1 }
 0x142   :  { %709 = vsyncpa [#allocation4 + $0x1], 1 }
 0x143   :  { %710 = vsyncpa [#allocation9], 1 }
 0x144   :  { %712 = vsyncpa [#allocation9 + $0x1], 1 }

</bundles_post_ra>
